<compile_context>
chip_gen: v6e
topology: v6e:2x2x1
jax: 0.10.0
libtpu: 0.0.40
codegen_flags: <defaults>
</compile_context>

<pallas_src>
import functools

import jax
import jax.numpy as jnp
import numpy as np
from jax.experimental import pallas as pl
from jax.experimental.pallas import tpu as pltpu

LN_EPS = 1e-4  # Glow-TTS style channel LayerNorm epsilon


def _round_up(n, m):
    return ((n + m - 1) // m) * m


# --------------------------- duration predictor kernel ---------------------------
def _duration_predictor_kernel(x_ref, mask_ref, ln_g_ref, ln_b_ref,
                               cwf_ref, cb_ref, ow_ref, ob_ref, dur_ref,
                               *, t_orig, n_layers, ksize):
    C = x_ref.shape[1]
    Tp = x_ref.shape[2]
    pad = ksize // 2

    mask_row = mask_ref[0].astype(jnp.float32)                  # (1, Tp)
    mask_full = jnp.broadcast_to(mask_row, (C, Tp))             # hoisted once

    # Hoisted per-tap SAME-padding validity masks, computed against the ORIGINAL
    # (unpadded) length so the zero-pad to Tp never leaks into valid columns.
    t_idx = jax.lax.broadcasted_iota(jnp.int32, (1, Tp), 1)
    tap_mask = []
    for tap in range(ksize):
        off = tap - pad
        if off == 0:
            tap_mask.append(None)
        else:
            tap_mask.append(
                ((t_idx + off >= 0) & (t_idx + off < t_orig)).astype(jnp.float32))

    h = x_ref[0].astype(jnp.float32)                            # (C, Tp)
    for l in range(n_layers):
        # LayerNorm over the channel axis (stats include masked columns, as in ref)
        mean = jnp.mean(h, axis=0, keepdims=True)
        var = jnp.mean((h - mean) ** 2, axis=0, keepdims=True)
        hn = (h - mean) * jax.lax.rsqrt(var + LN_EPS)
        hn = hn * ln_g_ref[l] + ln_b_ref[l]                     # (C,1) broadcast

        # Conv1d(same): one fused bf16 MXU matmul with a K*C contraction.
        taps = []
        for tap in range(ksize):
            off = tap - pad
            xs = hn if off == 0 else pltpu.roll(hn, shift=(-off) % Tp, axis=1)
            if tap_mask[tap] is not None:
                xs = xs * tap_mask[tap]
            taps.append(xs.astype(jnp.bfloat16))
        op = jnp.concatenate(taps, axis=0)                      # (K*C, Tp) bf16
        y = jnp.dot(cwf_ref[l], op, preferred_element_type=jnp.float32) + cb_ref[l]

        h = y * jax.nn.sigmoid(y)   # SiLU; dropout == identity in eval mode
        h = h * mask_full

    # Final 1x1 conv (Cout=1): VPU multiply + channel (sublane) reduce instead of
    # an M=1 MXU matmul; then mask and relu.
    d = jnp.sum(h * ow_ref[...], axis=0, keepdims=True) + ob_ref[...]
    d = jnp.maximum(d * mask_row, 0.0)
    dur_ref[0] = d.astype(dur_ref.dtype)


# ----------------------------- length regulator kernel ---------------------------
def _length_regulator_kernel(ml_ref, path_ref, z_ref):
    # ml_ref: (1, 2C, Tp) f32, path_ref: (1, Tp, TY_TILE) bf16 (0/1 -> exact)
    a = ml_ref[0].astype(jnp.bfloat16)
    z = jnp.dot(a, path_ref[0], preferred_element_type=jnp.float32)
    z_ref[0] = z.astype(z_ref.dtype)


# ----------------------------------- wrapper --------------------------------------
def variance_adopter_forward(x, x_mu, x_logs, x_mask, path, params, *, ty_tile=128):
    B, C, T = x.shape
    Ty = path.shape[-1]
    ln_g, ln_b, cw, cb, ow, ob = params
    L, K = cw.shape[0], cw.shape[3]

    Tp = _round_up(T, 128)
    Typ = _round_up(Ty, ty_tile)

    def pad_last(a, tgt):
        p = tgt - a.shape[-1]
        return a if p == 0 else jnp.pad(a, [(0, 0)] * (a.ndim - 1) + [(0, p)])

    x_p = pad_last(x.astype(jnp.float32), Tp)
    mask_p = pad_last(x_mask.astype(jnp.float32), Tp)
    # Stack x_mu / x_logs into one (B, 2C, Tp) operand -> single regulator matmul.
    ml_p = pad_last(jnp.concatenate([x_mu, x_logs], axis=1).astype(jnp.float32), Tp)
    # path is 0/1 -> bf16 cast is exact and halves its HBM read.
    path_p = jnp.pad(path, [(0, 0), (0, Tp - T), (0, Typ - Ty)]).astype(jnp.bfloat16)

    # Parameter repacking (layer-loop friendly, lane-contiguous slabs).
    ln_g_k = ln_g.reshape(L, C, 1).astype(jnp.float32)
    ln_b_k = ln_b.reshape(L, C, 1).astype(jnp.float32)
    # (L, Cout, Cin, K) -> (L, Cout, K*Cin): tap-major along the fused contraction.
    cwf_k = jnp.transpose(cw, (0, 1, 3, 2)).reshape(L, C, K * C).astype(jnp.bfloat16)
    cb_k = cb.reshape(L, C, 1).astype(jnp.float32)
    ow_k = ow.reshape(C, 1).astype(jnp.float32)     # 1x1 conv weight (1,C,1)->(C,1)
    ob_k = ob.reshape(1, 1).astype(jnp.float32)

    # --- duration predictor: grid over batch ---
    dur_p = pl.pallas_call(
        functools.partial(_duration_predictor_kernel,
                          t_orig=T, n_layers=L, ksize=K),
        out_shape=jax.ShapeDtypeStruct((B, 1, Tp), jnp.float32),
        grid=(B,),
        in_specs=[
            pl.BlockSpec((1, C, Tp), lambda b: (b, 0, 0)),       # x
            pl.BlockSpec((1, 1, Tp), lambda b: (b, 0, 0)),       # mask
            pl.BlockSpec((L, C, 1), lambda b: (0, 0, 0)),        # ln gamma
            pl.BlockSpec((L, C, 1), lambda b: (0, 0, 0)),        # ln beta
            pl.BlockSpec((L, C, K * C), lambda b: (0, 0, 0)),    # fused conv weights
            pl.BlockSpec((L, C, 1), lambda b: (0, 0, 0)),        # conv bias
            pl.BlockSpec((C, 1), lambda b: (0, 0)),              # out conv weight
            pl.BlockSpec((1, 1), lambda b: (0, 0)),              # out conv bias
        ],
        out_specs=pl.BlockSpec((1, 1, Tp), lambda b: (b, 0, 0)),
        compiler_params=pltpu.CompilerParams(
            dimension_semantics=("parallel",),
            vmem_limit_bytes=32 * 1024 * 1024),   # tiles tiny; safe on v7x (64 MiB)
    )(x_p, mask_p, ln_g_k, ln_b_k, cwf_k, cb_k, ow_k, ob_k)

    # --- length regulator: grid over (batch, Ty tiles), lane-dense 128-wide output ---
    z_p = pl.pallas_call(
        _length_regulator_kernel,
        out_shape=jax.ShapeDtypeStruct((B, 2 * C, Typ), jnp.float32),
        grid=(B, Typ // ty_tile),
        in_specs=[
            pl.BlockSpec((1, 2 * C, Tp), lambda b, ty: (b, 0, 0)),    # [x_mu; x_logs]
            pl.BlockSpec((1, Tp, ty_tile), lambda b, ty: (b, 0, ty)),  # path tile
        ],
        out_specs=pl.BlockSpec((1, 2 * C, ty_tile), lambda b, ty: (b, 0, ty)),
        compiler_params=pltpu.CompilerParams(
            dimension_semantics=("parallel", "parallel"),
            vmem_limit_bytes=32 * 1024 * 1024),
    )(ml_p, path_p)

    z_mu = z_p[:, :C, :Ty]
    z_logs = z_p[:, C:, :Ty]
    dur = dur_p[:, :, :T]
    return z_mu, z_logs, dur


# ---------------------------- pure-JAX f32 reference ----------------------------
def reference_forward(x, x_mu, x_logs, x_mask, path, params):
    ln_g, ln_b, cw, cb, ow, ob = params
    L = cw.shape[0]
    h = x
    for l in range(L):
        mean = h.mean(axis=1, keepdims=True)
        var = ((h - mean) ** 2).mean(axis=1, keepdims=True)
        hn = (h - mean) * jax.lax.rsqrt(var + LN_EPS)
        hn = hn * ln_g[l][None, :, None] + ln_b[l][None, :, None]
        y = jax.lax.conv_general_dilated(
            hn, cw[l], window_strides=(1,), padding="SAME",
            dimension_numbers=("NCH", "OIH", "NCH")) + cb[l][None, :, None]
        h = y * jax.nn.sigmoid(y)
        h = h * x_mask
    d = jax.lax.conv_general_dilated(
        h, ow, window_strides=(1,), padding="SAME",
        dimension_numbers=("NCH", "OIH", "NCH")) + ob[None, :, None]
    d = jnp.maximum(d * x_mask, 0.0)
    z_mu = jnp.matmul(x_mu, path)
    z_logs = jnp.matmul(x_logs, path)
    return z_mu, z_logs, d


if __name__ == "__main__":
    B, C, T, Ty = 2, 32, 16, 24
    n_layers, kernel_size = 2, 3

    key = jax.random.PRNGKey(0)
    ks = jax.random.split(key, 12)

    x = jax.random.normal(ks[0], (B, C, T), jnp.float32)
    x_mu = jax.random.normal(ks[1], (B, C, T), jnp.float32)
    x_logs = jax.random.normal(ks[2], (B, C, T), jnp.float32)

    # mask: first sequence full length, second shorter
    lengths = jnp.array([T, T - 5])
    x_mask = (jnp.arange(T)[None, :] < lengths[:, None]).astype(jnp.float32)[:, None, :]

    # 0/1 alignment path (B, T, Ty)
    path = (jax.random.uniform(ks[3], (B, T, Ty)) > 0.5).astype(jnp.float32)

    ln_g = jnp.ones((n_layers, C), jnp.float32) + 0.05 * jax.random.normal(ks[4], (n_layers, C))
    ln_b = 0.05 * jax.random.normal(ks[5], (n_layers, C))
    cw = 0.1 * jax.random.normal(ks[6], (n_layers, C, C, kernel_size), jnp.float32)
    cb = 0.05 * jax.random.normal(ks[7], (n_layers, C), jnp.float32)
    ow = 0.1 * jax.random.normal(ks[8], (1, C, 1), jnp.float32)
    ob = 0.05 * jax.random.normal(ks[9], (1,), jnp.float32)
    params = (ln_g, ln_b, cw, cb, ow, ob)

    z_mu, z_logs, dur = variance_adopter_forward(x, x_mu, x_logs, x_mask, path, params)
    jax.block_until_ready((z_mu, z_logs, dur))

    r_mu, r_logs, r_dur = reference_forward(x, x_mu, x_logs, x_mask, path, params)
    # bf16 MXU operands (per perf review) -> slightly looser tolerances than pure f32.
    np.testing.assert_allclose(np.asarray(z_mu), np.asarray(r_mu), rtol=2e-2, atol=3e-2)
    np.testing.assert_allclose(np.asarray(z_logs), np.asarray(r_logs), rtol=2e-2, atol=3e-2)
    np.testing.assert_allclose(np.asarray(dur), np.asarray(r_dur), rtol=2e-2, atol=3e-2)

    print("KERNEL_OK")
</pallas_src>

<mosaic_0001>
module attributes {stable_mosaic.version = 11 : i64} {
  func.func @_duration_predictor_kernel(%arg0: i32, %arg1: memref<1x32x128xf32, #tpu.memory_space<vmem>>, %arg2: memref<1x1x128xf32, #tpu.memory_space<vmem>>, %arg3: memref<2x32x1xf32, #tpu.memory_space<vmem>>, %arg4: memref<2x32x1xf32, #tpu.memory_space<vmem>>, %arg5: memref<2x32x96xbf16, #tpu.memory_space<vmem>>, %arg6: memref<2x32x1xf32, #tpu.memory_space<vmem>>, %arg7: memref<32x1xf32, #tpu.memory_space<vmem>>, %arg8: memref<1x1xf32, #tpu.memory_space<vmem>>, %arg9: memref<1x1x128xf32, #tpu.memory_space<vmem>>) attributes {dimension_semantics = [#tpu.dimension_semantics<parallel>], iteration_bounds = array<i64: 2>, scalar_prefetch = 0 : i64, scratch_operands = 0 : i64, tpu.core_type = #tpu.core_type<tc>, window_params = [{transform_indices = @transform_0, window_bounds = array<i64: 1, 32, 128>}, {transform_indices = @transform_1, window_bounds = array<i64: 1, 1, 128>}, {pipeline_mode = #tpu.pipeline_mode<synchronous>, transform_indices = @transform_2, window_bounds = array<i64: 2, 32, 1>}, {pipeline_mode = #tpu.pipeline_mode<synchronous>, transform_indices = @transform_3, window_bounds = array<i64: 2, 32, 1>}, {pipeline_mode = #tpu.pipeline_mode<synchronous>, transform_indices = @transform_4, window_bounds = array<i64: 2, 32, 96>}, {pipeline_mode = #tpu.pipeline_mode<synchronous>, transform_indices = @transform_5, window_bounds = array<i64: 2, 32, 1>}, {pipeline_mode = #tpu.pipeline_mode<synchronous>, transform_indices = @transform_6, window_bounds = array<i64: 32, 1>}, {pipeline_mode = #tpu.pipeline_mode<synchronous>, transform_indices = @transform_7, window_bounds = array<i64: 1, 1>}, {transform_indices = @transform_8, window_bounds = array<i64: 1, 1, 128>}]} {
    %c0 = arith.constant 0 : index
    %c0_0 = arith.constant 0 : index
    %c0_1 = arith.constant 0 : index
    %0 = vector.load %arg2[%c0, %c0_0, %c0_1] : memref<1x1x128xf32, #tpu.memory_space<vmem>>, vector<1x1x128xf32>
    %1 = vector.shape_cast %0 : vector<1x1x128xf32> to vector<1x128xf32>
    %2 = vector.shape_cast %1 : vector<1x128xf32> to vector<1x128xf32>
    %3 = vector.broadcast %2 : vector<1x128xf32> to vector<32x128xf32>
    %4 = tpu.iota {dimensions = array<i32: 1>} : vector<1x128xi32>
    %c-1_i32 = arith.constant -1 : i32
    %5 = vector.broadcast %c-1_i32 : i32 to vector<1x128xi32>
    %6 = arith.addi %4, %5 : vector<1x128xi32>
    %c0_i32 = arith.constant 0 : i32
    %7 = vector.broadcast %c0_i32 : i32 to vector<1x128xi32>
    %8 = arith.cmpi sge, %6, %7 : vector<1x128xi32>
    %c-1_i32_2 = arith.constant -1 : i32
    %9 = vector.broadcast %c-1_i32_2 : i32 to vector<1x128xi32>
    %10 = arith.addi %4, %9 : vector<1x128xi32>
    %c16_i32 = arith.constant 16 : i32
    %11 = vector.broadcast %c16_i32 : i32 to vector<1x128xi32>
    %12 = arith.cmpi slt, %10, %11 : vector<1x128xi32>
    %13 = arith.andi %8, %12 : vector<1x128xi1>
    %14 = arith.extui %13 : vector<1x128xi1> to vector<1x128xi32>
    %15 = arith.sitofp %14 : vector<1x128xi32> to vector<1x128xf32>
    %c1_i32 = arith.constant 1 : i32
    %16 = vector.broadcast %c1_i32 : i32 to vector<1x128xi32>
    %17 = arith.addi %4, %16 : vector<1x128xi32>
    %c0_i32_3 = arith.constant 0 : i32
    %18 = vector.broadcast %c0_i32_3 : i32 to vector<1x128xi32>
    %19 = arith.cmpi sge, %17, %18 : vector<1x128xi32>
    %c1_i32_4 = arith.constant 1 : i32
    %20 = vector.broadcast %c1_i32_4 : i32 to vector<1x128xi32>
    %21 = arith.addi %4, %20 : vector<1x128xi32>
    %c16_i32_5 = arith.constant 16 : i32
    %22 = vector.broadcast %c16_i32_5 : i32 to vector<1x128xi32>
    %23 = arith.cmpi slt, %21, %22 : vector<1x128xi32>
    %24 = arith.andi %19, %23 : vector<1x128xi1>
    %25 = arith.extui %24 : vector<1x128xi1> to vector<1x128xi32>
    %26 = arith.sitofp %25 : vector<1x128xi32> to vector<1x128xf32>
    %c0_6 = arith.constant 0 : index
    %c0_7 = arith.constant 0 : index
    %c0_8 = arith.constant 0 : index
    %27 = vector.load %arg1[%c0_6, %c0_7, %c0_8] : memref<1x32x128xf32, #tpu.memory_space<vmem>>, vector<1x32x128xf32>
    %28 = vector.shape_cast %27 : vector<1x32x128xf32> to vector<32x128xf32>
    %cst = arith.constant dense<0.000000e+00> : vector<128xf32>
    %29 = vector.multi_reduction <add>, %28, %cst [0] : vector<32x128xf32> to vector<128xf32>
    %30 = vector.shape_cast %29 : vector<128xf32> to vector<1x128xf32>
    %cst_9 = arith.constant 3.200000e+01 : f32
    %31 = vector.broadcast %cst_9 : f32 to vector<1x128xf32>
    %32 = arith.divf %30, %31 : vector<1x128xf32>
    %33 = vector.broadcast %32 : vector<1x128xf32> to vector<32x128xf32>
    %34 = arith.subf %28, %33 : vector<32x128xf32>
    %35 = arith.mulf %34, %34 : vector<32x128xf32>
    %cst_10 = arith.constant dense<0.000000e+00> : vector<128xf32>
    %36 = vector.multi_reduction <add>, %35, %cst_10 [0] : vector<32x128xf32> to vector<128xf32>
    %37 = vector.shape_cast %36 : vector<128xf32> to vector<1x128xf32>
    %cst_11 = arith.constant 3.200000e+01 : f32
    %38 = vector.broadcast %cst_11 : f32 to vector<1x128xf32>
    %39 = arith.divf %37, %38 : vector<1x128xf32>
    %40 = vector.broadcast %32 : vector<1x128xf32> to vector<32x128xf32>
    %41 = arith.subf %28, %40 : vector<32x128xf32>
    %cst_12 = arith.constant 9.99999974E-5 : f32
    %42 = vector.broadcast %cst_12 : f32 to vector<1x128xf32>
    %43 = arith.addf %39, %42 : vector<1x128xf32>
    %44 = math.rsqrt %43 : vector<1x128xf32>
    %45 = vector.broadcast %44 : vector<1x128xf32> to vector<32x128xf32>
    %46 = arith.mulf %41, %45 : vector<32x128xf32>
    %c0_13 = arith.constant 0 : index
    %c0_14 = arith.constant 0 : index
    %c0_15 = arith.constant 0 : index
    %47 = vector.load %arg3[%c0_13, %c0_14, %c0_15] : memref<2x32x1xf32, #tpu.memory_space<vmem>>, vector<1x32x1xf32>
    %48 = vector.shape_cast %47 : vector<1x32x1xf32> to vector<32x1xf32>
    %49 = vector.broadcast %48 : vector<32x1xf32> to vector<32x128xf32>
    %50 = arith.mulf %46, %49 : vector<32x128xf32>
    %c0_16 = arith.constant 0 : index
    %c0_17 = arith.constant 0 : index
    %c0_18 = arith.constant 0 : index
    %51 = vector.load %arg4[%c0_16, %c0_17, %c0_18] : memref<2x32x1xf32, #tpu.memory_space<vmem>>, vector<1x32x1xf32>
    %52 = vector.shape_cast %51 : vector<1x32x1xf32> to vector<32x1xf32>
    %53 = vector.broadcast %52 : vector<32x1xf32> to vector<32x128xf32>
    %54 = arith.addf %50, %53 : vector<32x128xf32>
    %c1_i32_19 = arith.constant 1 : i32
    %55 = tpu.dynamic_rotate %54 by %c1_i32_19 dim 1 : vector<32x128xf32>, i32 -> vector<32x128xf32>
    %56 = vector.broadcast %15 : vector<1x128xf32> to vector<32x128xf32>
    %57 = arith.mulf %55, %56 : vector<32x128xf32>
    %58 = arith.truncf %57 : vector<32x128xf32> to vector<32x128xbf16>
    %59 = arith.truncf %54 : vector<32x128xf32> to vector<32x128xbf16>
    %c127_i32 = arith.constant 127 : i32
    %60 = tpu.dynamic_rotate %54 by %c127_i32 dim 1 : vector<32x128xf32>, i32 -> vector<32x128xf32>
    %61 = vector.broadcast %26 : vector<1x128xf32> to vector<32x128xf32>
    %62 = arith.mulf %60, %61 : vector<32x128xf32>
    %63 = arith.truncf %62 : vector<32x128xf32> to vector<32x128xbf16>
    %64 = tpu.concatenate %58, %59, %63 in 0 : vector<32x128xbf16>, vector<32x128xbf16>, vector<32x128xbf16> -> vector<96x128xbf16>
    %c0_20 = arith.constant 0 : index
    %c0_21 = arith.constant 0 : index
    %c0_22 = arith.constant 0 : index
    %65 = vector.load %arg5[%c0_20, %c0_21, %c0_22] : memref<2x32x96xbf16, #tpu.memory_space<vmem>>, vector<1x32x96xbf16>
    %66 = vector.shape_cast %65 : vector<1x32x96xbf16> to vector<32x96xbf16>
    %cst_23 = arith.constant dense<0.000000e+00> : vector<32x128xf32>
    %67 = tpu.matmul %66, %64, %cst_23 {dimension_numbers = #tpu.dot_dimension_numbers<[1], [0], [0], [1], [0, 0, 1, 1], [], []>} : vector<32x96xbf16>, vector<96x128xbf16>, vector<32x128xf32> -> vector<32x128xf32>
    %c0_24 = arith.constant 0 : index
    %c0_25 = arith.constant 0 : index
    %c0_26 = arith.constant 0 : index
    %68 = vector.load %arg6[%c0_24, %c0_25, %c0_26] : memref<2x32x1xf32, #tpu.memory_space<vmem>>, vector<1x32x1xf32>
    %69 = vector.shape_cast %68 : vector<1x32x1xf32> to vector<32x1xf32>
    %70 = vector.broadcast %69 : vector<32x1xf32> to vector<32x128xf32>
    %71 = arith.addf %67, %70 : vector<32x128xf32>
    %72 = arith.negf %71 : vector<32x128xf32>
    %73 = math.exp %72 : vector<32x128xf32>
    %cst_27 = arith.constant 1.000000e+00 : f32
    %74 = vector.broadcast %cst_27 : f32 to vector<32x128xf32>
    %75 = arith.addf %74, %73 : vector<32x128xf32>
    %76 = arith.divf %74, %75 : vector<32x128xf32>
    %77 = arith.mulf %71, %76 : vector<32x128xf32>
    %78 = arith.mulf %77, %3 : vector<32x128xf32>
    %cst_28 = arith.constant dense<0.000000e+00> : vector<128xf32>
    %79 = vector.multi_reduction <add>, %78, %cst_28 [0] : vector<32x128xf32> to vector<128xf32>
    %80 = vector.shape_cast %79 : vector<128xf32> to vector<1x128xf32>
    %cst_29 = arith.constant 3.200000e+01 : f32
    %81 = vector.broadcast %cst_29 : f32 to vector<1x128xf32>
    %82 = arith.divf %80, %81 : vector<1x128xf32>
    %83 = vector.broadcast %82 : vector<1x128xf32> to vector<32x128xf32>
    %84 = arith.subf %78, %83 : vector<32x128xf32>
    %85 = arith.mulf %84, %84 : vector<32x128xf32>
    %cst_30 = arith.constant dense<0.000000e+00> : vector<128xf32>
    %86 = vector.multi_reduction <add>, %85, %cst_30 [0] : vector<32x128xf32> to vector<128xf32>
    %87 = vector.shape_cast %86 : vector<128xf32> to vector<1x128xf32>
    %cst_31 = arith.constant 3.200000e+01 : f32
    %88 = vector.broadcast %cst_31 : f32 to vector<1x128xf32>
    %89 = arith.divf %87, %88 : vector<1x128xf32>
    %90 = vector.broadcast %82 : vector<1x128xf32> to vector<32x128xf32>
    %91 = arith.subf %78, %90 : vector<32x128xf32>
    %cst_32 = arith.constant 9.99999974E-5 : f32
    %92 = vector.broadcast %cst_32 : f32 to vector<1x128xf32>
    %93 = arith.addf %89, %92 : vector<1x128xf32>
    %94 = math.rsqrt %93 : vector<1x128xf32>
    %95 = vector.broadcast %94 : vector<1x128xf32> to vector<32x128xf32>
    %96 = arith.mulf %91, %95 : vector<32x128xf32>
    %c1 = arith.constant 1 : index
    %c0_33 = arith.constant 0 : index
    %c0_34 = arith.constant 0 : index
    %97 = vector.load %arg3[%c1, %c0_33, %c0_34] : memref<2x32x1xf32, #tpu.memory_space<vmem>>, vector<1x32x1xf32>
    %98 = vector.shape_cast %97 : vector<1x32x1xf32> to vector<32x1xf32>
    %99 = vector.broadcast %98 : vector<32x1xf32> to vector<32x128xf32>
    %100 = arith.mulf %96, %99 : vector<32x128xf32>
    %c1_35 = arith.constant 1 : index
    %c0_36 = arith.constant 0 : index
    %c0_37 = arith.constant 0 : index
    %101 = vector.load %arg4[%c1_35, %c0_36, %c0_37] : memref<2x32x1xf32, #tpu.memory_space<vmem>>, vector<1x32x1xf32>
    %102 = vector.shape_cast %101 : vector<1x32x1xf32> to vector<32x1xf32>
    %103 = vector.broadcast %102 : vector<32x1xf32> to vector<32x128xf32>
    %104 = arith.addf %100, %103 : vector<32x128xf32>
    %c1_i32_38 = arith.constant 1 : i32
    %105 = tpu.dynamic_rotate %104 by %c1_i32_38 dim 1 : vector<32x128xf32>, i32 -> vector<32x128xf32>
    %106 = vector.broadcast %15 : vector<1x128xf32> to vector<32x128xf32>
    %107 = arith.mulf %105, %106 : vector<32x128xf32>
    %108 = arith.truncf %107 : vector<32x128xf32> to vector<32x128xbf16>
    %109 = arith.truncf %104 : vector<32x128xf32> to vector<32x128xbf16>
    %c127_i32_39 = arith.constant 127 : i32
    %110 = tpu.dynamic_rotate %104 by %c127_i32_39 dim 1 : vector<32x128xf32>, i32 -> vector<32x128xf32>
    %111 = vector.broadcast %26 : vector<1x128xf32> to vector<32x128xf32>
    %112 = arith.mulf %110, %111 : vector<32x128xf32>
    %113 = arith.truncf %112 : vector<32x128xf32> to vector<32x128xbf16>
    %114 = tpu.concatenate %108, %109, %113 in 0 : vector<32x128xbf16>, vector<32x128xbf16>, vector<32x128xbf16> -> vector<96x128xbf16>
    %c1_40 = arith.constant 1 : index
    %c0_41 = arith.constant 0 : index
    %c0_42 = arith.constant 0 : index
    %115 = vector.load %arg5[%c1_40, %c0_41, %c0_42] : memref<2x32x96xbf16, #tpu.memory_space<vmem>>, vector<1x32x96xbf16>
    %116 = vector.shape_cast %115 : vector<1x32x96xbf16> to vector<32x96xbf16>
    %cst_43 = arith.constant dense<0.000000e+00> : vector<32x128xf32>
    %117 = tpu.matmul %116, %114, %cst_43 {dimension_numbers = #tpu.dot_dimension_numbers<[1], [0], [0], [1], [0, 0, 1, 1], [], []>} : vector<32x96xbf16>, vector<96x128xbf16>, vector<32x128xf32> -> vector<32x128xf32>
    %c1_44 = arith.constant 1 : index
    %c0_45 = arith.constant 0 : index
    %c0_46 = arith.constant 0 : index
    %118 = vector.load %arg6[%c1_44, %c0_45, %c0_46] : memref<2x32x1xf32, #tpu.memory_space<vmem>>, vector<1x32x1xf32>
    %119 = vector.shape_cast %118 : vector<1x32x1xf32> to vector<32x1xf32>
    %120 = vector.broadcast %119 : vector<32x1xf32> to vector<32x128xf32>
    %121 = arith.addf %117, %120 : vector<32x128xf32>
    %122 = arith.negf %121 : vector<32x128xf32>
    %123 = math.exp %122 : vector<32x128xf32>
    %cst_47 = arith.constant 1.000000e+00 : f32
    %124 = vector.broadcast %cst_47 : f32 to vector<32x128xf32>
    %125 = arith.addf %124, %123 : vector<32x128xf32>
    %126 = arith.divf %124, %125 : vector<32x128xf32>
    %127 = arith.mulf %121, %126 : vector<32x128xf32>
    %128 = arith.mulf %127, %3 : vector<32x128xf32>
    %c0_48 = arith.constant 0 : index
    %c0_49 = arith.constant 0 : index
    %129 = vector.load %arg7[%c0_48, %c0_49] : memref<32x1xf32, #tpu.memory_space<vmem>>, vector<32x1xf32>
    %130 = vector.broadcast %129 : vector<32x1xf32> to vector<32x128xf32>
    %131 = arith.mulf %128, %130 : vector<32x128xf32>
    %cst_50 = arith.constant dense<0.000000e+00> : vector<128xf32>
    %132 = vector.multi_reduction <add>, %131, %cst_50 [0] : vector<32x128xf32> to vector<128xf32>
    %133 = vector.shape_cast %132 : vector<128xf32> to vector<1x128xf32>
    %c0_51 = arith.constant 0 : index
    %c0_52 = arith.constant 0 : index
    %134 = vector.load %arg8[%c0_51, %c0_52] : memref<1x1xf32, #tpu.memory_space<vmem>>, vector<1x1xf32>
    %135 = vector.broadcast %134 : vector<1x1xf32> to vector<1x128xf32>
    %136 = arith.addf %133, %135 : vector<1x128xf32>
    %137 = arith.mulf %136, %1 : vector<1x128xf32>
    %cst_53 = arith.constant 0.000000e+00 : f32
    %138 = vector.broadcast %cst_53 : f32 to vector<1x128xf32>
    %139 = arith.maximumf %137, %138 : vector<1x128xf32>
    %c0_54 = arith.constant 0 : index
    %c0_55 = arith.constant 0 : index
    %c0_56 = arith.constant 0 : index
    %140 = vector.load %arg9[%c0_54, %c0_55, %c0_56] : memref<1x1x128xf32, #tpu.memory_space<vmem>>, vector<1x1x128xf32>
    %141 = vector.shape_cast %140 : vector<1x1x128xf32> to vector<1x128xf32>
    %142 = vector.shape_cast %139 : vector<1x128xf32> to vector<1x1x128xf32>
    tpu.vector_store %arg9[%c0_54, %c0_55, %c0_56], %142 {strides = array<i32>} : memref<1x1x128xf32, #tpu.memory_space<vmem>>, vector<1x1x128xf32>,
    return
  }
  func.func @transform_0(%arg0: i32) -> (i32, i32, i32) {
    %c0_i32 = arith.constant 0 : i32
    %c0_i32_0 = arith.constant 0 : i32
    %c0_i32_1 = arith.constant 0 : i32
    return %arg0, %c0_i32, %c0_i32_0 : i32, i32, i32
  }
  func.func @transform_1(%arg0: i32) -> (i32, i32, i32) {
    %c0_i32 = arith.constant 0 : i32
    %c0_i32_0 = arith.constant 0 : i32
    %c0_i32_1 = arith.constant 0 : i32
    return %arg0, %c0_i32, %c0_i32_0 : i32, i32, i32
  }
  func.func @transform_2(%arg0: i32) -> (i32, i32, i32) {
    %c0_i32 = arith.constant 0 : i32
    %c0_i32_0 = arith.constant 0 : i32
    %c0_i32_1 = arith.constant 0 : i32
    %c0_i32_2 = arith.constant 0 : i32
    return %c0_i32, %c0_i32_0, %c0_i32_1 : i32, i32, i32
  }
  func.func @transform_3(%arg0: i32) -> (i32, i32, i32) {
    %c0_i32 = arith.constant 0 : i32
    %c0_i32_0 = arith.constant 0 : i32
    %c0_i32_1 = arith.constant 0 : i32
    %c0_i32_2 = arith.constant 0 : i32
    return %c0_i32, %c0_i32_0, %c0_i32_1 : i32, i32, i32
  }
  func.func @transform_4(%arg0: i32) -> (i32, i32, i32) {
    %c0_i32 = arith.constant 0 : i32
    %c0_i32_0 = arith.constant 0 : i32
    %c0_i32_1 = arith.constant 0 : i32
    %c0_i32_2 = arith.constant 0 : i32
    return %c0_i32, %c0_i32_0, %c0_i32_1 : i32, i32, i32
  }
  func.func @transform_5(%arg0: i32) -> (i32, i32, i32) {
    %c0_i32 = arith.constant 0 : i32
    %c0_i32_0 = arith.constant 0 : i32
    %c0_i32_1 = arith.constant 0 : i32
    %c0_i32_2 = arith.constant 0 : i32
    return %c0_i32, %c0_i32_0, %c0_i32_1 : i32, i32, i32
  }
  func.func @transform_6(%arg0: i32) -> (i32, i32) {
    %c0_i32 = arith.constant 0 : i32
    %c0_i32_0 = arith.constant 0 : i32
    %c0_i32_1 = arith.constant 0 : i32
    return %c0_i32, %c0_i32_0 : i32, i32
  }
  func.func @transform_7(%arg0: i32) -> (i32, i32) {
    %c0_i32 = arith.constant 0 : i32
    %c0_i32_0 = arith.constant 0 : i32
    %c0_i32_1 = arith.constant 0 : i32
    return %c0_i32, %c0_i32_0 : i32, i32
  }
  func.func @transform_8(%arg0: i32) -> (i32, i32, i32) {
    %c0_i32 = arith.constant 0 : i32
    %c0_i32_0 = arith.constant 0 : i32
    %c0_i32_1 = arith.constant 0 : i32
    return %arg0, %c0_i32, %c0_i32_0 : i32, i32, i32
  }
}

</mosaic_0001>

<bundles_post_ra>
// kernel: tpu_custom_call.1
= control target key start
LH: loop header
LB: loop body
LE: loop exit
PB: predicated region body
PF: predicated region fallthrough
CT: control target
= control target key end

     0   :  { %s1522_s0 = inlined_call_operand.vmem [shape: f32[2,32,128], index: 0, kind: input, shape index: {}]   ;;  %s1523_s1 = inlined_call_operand.vmem [shape: f32[2,1,128], index: 1, kind: input, shape index: {}]   ;;  %s1524_s2 = inlined_call_operand.vmem [shape: f32[2,32,1], index: 2, kind: input, shape index: {}]   ;;  %s1525_s3 = inlined_call_operand.vmem [shape: f32[2,32,1], index: 3, kind: input, shape index: {}]   ;;  %s1526_s4 = inlined_call_operand.vmem [shape: bf16[2,32,96], index: 4, kind: input, shape index: {}]   ;;  %s1527_s5 = inlined_call_operand.vmem [shape: f32[2,32,1], index: 5, kind: input, shape index: {}]   ;;  %s1528_s6 = inlined_call_operand.vmem [shape: f32[32,1], index: 6, kind: input, shape index: {}]   ;;  %s1529_s7 = inlined_call_operand.<no memory space> [shape: f32[1,1], index: 7, kind: input, shape index: {}]   ;;  %s1530_s8 = inlined_call_operand.hbm [shape: f32[2,1,128], index: 8, kind: output, shape index: {}]  }
   0x1   :  { %v13_v0 = vstv %s1529_s7 }
   0x2   :  { %14 = vst [vmem:[#allocation2] sm:$0x1] %v13_v0 }
   0x3   :  { %15 = vsyncpa [#allocation4], 0 }
   0x4   :  { %17 = vsyncpa [#allocation4 + $0x1], 0  ;;  %s1261_s29 = smov 0   ;;  %s1263_s30 = smov 0  }
   0x5   :  { %s1265_s9 = smov 0   ;;  %s1267_s10 = smov 0  }
   0x6 LB: > { %s1282_s7 = sadd.s32 4294967295, %s1206_s10   ;;  %s969_s11 = sadd.s32 4294967294, %s1206_s10   ;;  %s1206_s10 = sphi %s1267_s10, %s1536_s10   ;;  %s1202_s9 = sphi %s1265_s9, %s1535_s9   ;;  %s1198_s30 = sphi %s1263_s30, %s1534_s30   ;;  %s1194_s29 = sphi %s1261_s29, %s1533_s29  }
   0x7   : > { %s1286_s12 = sadd.s32 1, %s1206_s10   ;;  %s208_s13 = sadd.s32 1, %s1202_s9 }
   0x8   : > { %s205_s14 = ssub.s32 %s1206_s10, %s1286_s12  ;;  %p218_p0 = scmp.ne.s32.totalorder %s1202_s9, %s1198_s30 }
   0x9   : > { %p206_p1 = scmp.eq.s32.totalorder %s205_s14, 0  ;;  %p219_p2 = scmp.eq.s32.totalorder %s1282_s7, 1 }
   0xa   : > { %p224_p3 = scmp.ne.s32.totalorder %s1198_s30, %s1194_s29  ;;  %p225_p4 = scmp.eq.s32.totalorder %s969_s11, 1 }
   0xb   : > { %s1297_s15 = scalar_select %p206_p1, %s1202_s9, %s208_s13  }
   0xc   : > { %p1299_p5 = por %p219_p2, %p218_p0  ;;  %p1303_p6 = por %p225_p4, %p224_p3 }
   0xd   : > { %p972_p7 = scmp.ge.s32.totalorder %s1206_s10, 1  ;;  %p275_p8 = scmp.lt.s32.totalorder %s1206_s10, 3 }
   0xf   : > { %p276_p9 = pnand %p972_p7, %p275_p8 }
  0x10   : > { %p311_p10 = scmp.lt.s32.totalorder (!%p276_p9), %s1282_s7, 1  ;;  %s1209_s25 = smov (!%p276_p9), 127  }
  0x11   : > { %279 = sbr.rel (%p276_p9) target bundleno = 1023 (0x3ff), region = 52  ;;  %s1009_s14 = sshll.u32 (!%p276_p9), %s1282_s7, 4 }
  0x12   : > { %s903_s21 = scalar_lea.hbm (!%p276_p9), %s1530_s8, %s1009_s14  ;;  %s1212_s23 = smov (!%p276_p9), [#allocation3]  }
  0x13   : > { %s1150_s24 = sshll.u32 (!%p276_p9), %s1212_s23, 4  ;;  %s1151_s24 = int_to_ptr.vmem [resolvable:$false] %s1150_s24 }
  0x16   : > { %v410_v1 = vld [vmem:[%s1525_s3 + $0x10] sm:$0xff]  ;;  %v1208_v3 = vmov 0   ;;  %v411_v4 = vld [vmem:[%s1525_s3 + $0x18] sm:$0xff]  ;;  %s1323_s26 = scalar_select %p311_p10, %s1282_s7, 1  ;;  %v381_v6 = vld [vmem:[%s1524_s2 + $0x8] sm:$0xff]  ;;  %vm504_vm0 = vcmask 785408  }
  0x17   : > { %v382_v2 = vld [vmem:[%s1524_s2 + $0x10] sm:$0xff]  ;;  %1105 = vset.pattern.permute.xlu1 %v1208_v3  ;;  %1104 = vset.pattern.permute.xlu0 %v1208_v3  ;;  %v383_v5 = vld [vmem:[%s1524_s2 + $0x18] sm:$0xff]  ;;  %v380_v7 = vld [vmem:[%s1524_s2] sm:$0xff]  ;;  %s1152_s7 = scalar_lea.vmem %s1151_s24, 32 }
  0x18   : > { %424 = vperm.xlu1 %1105, %v410_v1   ;;  %396 = vperm.xlu0 %1104, %v382_v2   ;;  %s1012_s27 = sshll.u32 %s1323_s26, 5  ;;  %v409_v8 = vld [vmem:[%s1525_s3 + $0x8] sm:$0xff]  ;;  %v408_v9 = vld [vmem:[%s1525_s3] sm:$0xff]  ;;  %s318_s22 = scalar_lea.vmem %s1523_s1, %s1323_s26 }
  0x19   : > { %s315_s20 = scalar_lea.vmem %s1522_s0, %s1012_s27  ;;  %s1210_s27 = smov 1   ;;  %v1106_v2 = vld [vmem:[%s1526_s4] sm:$0xff]   ;;  %v471_v3 = vld [vmem:[%s1527_s5 + $0x8] sm:$0xff] }
  0x1a   : > { %v341_v10 = vld [vmem:[%s315_s20] sm:$0xff]  ;;  %v342_v11 = vld [vmem:[%s315_s20 + $0x8] sm:$0xff]  ;;  %v343_v13 = vld [vmem:[%s315_s20 + $0x10] sm:$0xff]  ;;  %1041 = vmatprep.mubr.msk.bf16.mxu0 %vm504_vm0, %v1106_v2 }
  0x1b   : > { %v345_v12 = vadd.f32 %v342_v11, %v341_v10  ;;  %v344_v15 = vld [vmem:[%s315_s20 + $0x18] sm:$0xff] }
  0x1c   : > { %429 = vperm.xlu1 %1105, %v411_v4   ;;  %401 = vperm.xlu0 %1104, %v383_v5   ;;  %v470_v4 = vld [vmem:[%s1527_s5] sm:$0xff]  ;;  %v473_v5 = vld [vmem:[%s1527_s5 + $0x18] sm:$0xff] }
  0x1d   : > { %v346_v14 = vadd.f32 %v345_v12, %v343_v13  ;;  %v985_v12 = vld [vmem:[%s1524_s2 + $0x20] sm:$0xff] }
  0x1f   : > { %v347_v16 = vadd.f32 %v346_v14, %v344_v15  ;;  %v989_v14 = vld [vmem:[%s1525_s3 + $0x20] sm:$0xff] }
  0x20   : > { %391 = vperm.xlu1 %1105, %v381_v6   ;;  %386 = vperm.xlu0 %1104, %v380_v7   ;;  %v472_v6 = vld [vmem:[%s1527_s5 + $0x10] sm:$0xff]  ;;  %v988_v7 = vld [vmem:[%s1524_s2 + $0x38] sm:$0xff] }
  0x21   : > { %v348_v17 = vrot.slane %v347_v16, 4 }
  0x23   : > { %v349_v18 = vadd.f32 %v348_v17, %v347_v16 }
  0x24   : > { %419 = vperm.xlu1 %1105, %v409_v8   ;;  %414 = vperm.xlu0 %1104, %v408_v9   ;;  %v987_v8 = vld [vmem:[%s1524_s2 + $0x30] sm:$0xff]  ;;  %v992_v9 = vld [vmem:[%s1525_s3 + $0x38] sm:$0xff] }
  0x25   : > { %v350_v19 = vrot.slane %v349_v18, 2 }
  0x27   : > { %v351_v20 = vadd.f32 %v350_v19, %v349_v18  ;;  %v1211_v18 = vmov 0.0  }
  0x29   : > { %v352_v21 = vrot.slane %v351_v20, 1 }
  0x2b   : > { %v353_v22 = vadd.f32 %v352_v21, %v351_v20 }
  0x2d   : > { %v355_v23 = vmul.f32 0.03125, %v353_v22 }
  0x2f   : > { %v356_v24 = vsub.f32 %v341_v10, %v355_v23  ;;  %v357_v25 = vsub.f32 %v342_v11, %v355_v23  ;;  %v358_v26 = vsub.f32 %v343_v13, %v355_v23  ;;  %v359_v29 = vsub.f32 %v344_v15, %v355_v23  ;;  %v991_v10 = vld [vmem:[%s1525_s3 + $0x30] sm:$0xff]  ;;  %v986_v11 = vld [vmem:[%s1524_s2 + $0x28] sm:$0xff] }
  0x30   : > { %v990_v13 = vld [vmem:[%s1525_s3 + $0x28] sm:$0xff]  ;;  %v322_v15 = vlaneseq }
  0x31   : > { %v360_v27 = vmul.f32 %v356_v24, %v356_v24  ;;  %v361_v28 = vmul.f32 %v357_v25, %v357_v25  ;;  %v362_v30 = vmul.f32 %v358_v26, %v358_v26  ;;  %v363_v32 = vmul.f32 %v359_v29, %v359_v29 }
  0x32   : > { %v328_v16 = vand.u32 127, %v322_v15 }
  0x33   : > { %v364_v31 = vadd.f32 %v361_v28, %v360_v27 }
  0x34   : > { %v335_v17 = vadd.s32 1, %v328_v16 }
  0x35   : > { %v365_v33 = vadd.f32 %v364_v31, %v362_v30 }
  0x36   : > { %vm337_vm1 = vcmp.lt.s32.totalorder %v335_v17, 16 }
  0x37   : > { %v366_v34 = vadd.f32 %v365_v33, %v363_v32  ;;  %v1394_v19 = vsel %vm337_vm1, 1.0, %v1211_v18 }
  0x39   : > { %v367_v35 = vrot.slane %v366_v34, 4 }
  0x3b   : > { %v368_v36 = vadd.f32 %v367_v35, %v366_v34 }
  0x3d   : > { %v369_v37 = vrot.slane %v368_v36, 2 }
  0x3f   : > { %v370_v38 = vadd.f32 %v369_v37, %v368_v36 }
  0x41   : > { %v371_v39 = vrot.slane %v370_v38, 1 }
  0x43   : > { %v372_v40 = vadd.f32 %v371_v39, %v370_v38 }
  0x45   : > { %v373_v41 = vmul.f32 0.03125, %v372_v40 }
  0x47   : > { %v374_v42 = vadd.f32 0.0001, %v373_v41 }
  0x49   : > { %1110 = vrsqrt.f32 %v374_v42  ;;  %v1107_v42 = vld [vmem:[%s1526_s4 + $0x8] sm:$0xff]  }
  0x56   : > { %v1111_v43 = vpop.eup %1110 }
  0x57   : > { %v378_v44 = vmul.f32 %v1111_v43, %v358_v26  ;;  %v379_v48 = vmul.f32 %v1111_v43, %v359_v29  ;;  %v377_v54 = vmul.f32 %v1111_v43, %v357_v25  ;;  %v376_v55 = vmul.f32 %v1111_v43, %v356_v24 }
  0x58   : > { %v329_v24 = vadd.s32 4294967295, %v328_v16 }
  0x5a   : > { %vm330_vm2 = vcmp.ge.s32.totalorder %v329_v24, 0  ;;  %vm331_vm3 = vcmp.lt.s32.totalorder %v329_v24, 16 }
  0x5b   : > { %vm332_vm4 = vmand %vm330_vm2, %vm331_vm3 }
  0x5c   : > { %v1400_v33 = vsel %vm332_vm4, 1.0, %v1211_v18 }
  0x93   : > { %v425_v45 = vpop.permute.xlu1 %424  ;;  %v397_v46 = vpop.permute.xlu0 %396 }
  0x94   : > { %v406_v47 = vmul.f32 %v397_v46, %v378_v44 }
  0x96   : > { %v434_v49 = vadd.f32 %v425_v45, %v406_v47 }
  0x97   : > { %v430_v50 = vpop.permute.xlu1 %429  ;;  %v402_v51 = vpop.permute.xlu0 %401 }
  0x98   : > { %v407_v52 = vmul.f32 %v402_v51, %v379_v48  ;;  %456 = vrot.lane.b32.xlu0 %v434_v49, %s1209_s25 }
  0x9a   : > { %v435_v53 = vadd.f32 %v430_v50, %v407_v52 }
  0x9b   : > { %v392_v56 = vpop.permute.xlu1 %391  ;;  %v387_v57 = vpop.permute.xlu0 %386 }
  0x9c   : > { %458 = vrot.lane.b32.xlu1 %v435_v53, %s1209_s25  ;;  %v1343_v58 = vpack.c.bf16 %v435_v53, %v434_v49  ;;  %v405_v59 = vmul.f32 %v392_v56, %v377_v54  ;;  %v404_v60 = vmul.f32 %v387_v57, %v376_v55 }
  0x9f   : > { %v420_v61 = vpop.permute.xlu1 %419  ;;  %v415_v62 = vpop.permute.xlu0 %414 }
  0xa0   : > { %v433_v63 = vadd.f32 %v420_v61, %v405_v59  ;;  %v432_v0 = vadd.f32 %v415_v62, %v404_v60 }
  0xa2   : > { %454 = vrot.lane.b32.xlu1 %v433_v63, %s1209_s25  ;;  %452 = vrot.lane.b32.xlu0 %v432_v0, %s1209_s25  ;;  %v1347_v1 = vpack.c.bf16 %v433_v63, %v432_v0 }
  0xa6   : > { %442 = vrot.lane.b32.xlu1 %v435_v53, %s1210_s27  ;;  %440 = vrot.lane.b32.xlu0 %v434_v49, %s1210_s27 }
  0xaa   : > { %438 = vrot.lane.b32.xlu1 %v433_v63, %s1210_s27  ;;  %436 = vrot.lane.b32.xlu0 %v432_v0, %s1210_s27 }
  0xae   : > { %481 = vperm.xlu1 %1105, %v471_v3   ;;  %476 = vperm.xlu0 %1104, %v470_v4   ;;  %v1415_v3 = vshrl.u32 %v322_v15, 7 }
  0xb2   : > { %491 = vperm.xlu1 %1105, %v473_v5   ;;  %486 = vperm.xlu0 %1104, %v472_v6   ;;  %v324_v5 = vsub.s32 0, %v1415_v3 }
  0xb6   : > { %648 = vperm.xlu1 %1105, %v988_v7   ;;  %643 = vperm.xlu0 %1104, %v987_v8   ;;  %v1422_v7 = vld [vmem:[%s318_s22] sm:$0x1] }
  0xba   : > { %677 = vperm.xlu1 %1105, %v992_v9   ;;  %672 = vperm.xlu0 %1104, %v991_v10  }
  0xbe   : > { %638 = vperm.xlu1 %1105, %v986_v11   ;;  %633 = vperm.xlu0 %1104, %v985_v12   ;;  %v1427_v11 = vrot.slane %v1422_v7, %v324_v5 }
  0xc2   : > { %667 = vperm.xlu1 %1105, %v990_v13   ;;  %662 = vperm.xlu0 %1104, %v989_v14  }
 0x10a   : > { %v457_v20 = vpop.permute.xlu0 %456 }
 0x10b   : > { %v462_v22 = vmul.f32 %v1394_v19, %v457_v20 }
 0x10e   : > { %v459_v21 = vpop.permute.xlu1 %458 }
 0x10f   : > { %v463_v23 = vmul.f32 %v1394_v19, %v459_v21 }
 0x111   : > { %v465_v25 = vpack.c.bf16 %v463_v23, %v462_v22 }
 0x113   : > { %1029 = vmatprep.subr.bf16.mxu0 %v465_v25 }
 0x114   : > { %1030 = vmatpush3.bf16.msra.mxu0 %v465_v25  ;;  %v455_v26 = vpop.permute.xlu1 %454  ;;  %v453_v27 = vpop.permute.xlu0 %452 }
 0x115   : > { %v461_v28 = vmul.f32 %v1394_v19, %v455_v26  ;;  %v460_v29 = vmul.f32 %v1394_v19, %v453_v27 }
 0x117   : > { %v464_v30 = vpack.c.bf16 %v461_v28, %v460_v29 }
 0x118   : > { %v443_v31 = vpop.permute.xlu1 %442  ;;  %v441_v32 = vpop.permute.xlu0 %440 }
 0x119   : > { %1031 = vmatprep.subr.bf16.mxu0 %v464_v30  ;;  %v447_v34 = vmul.f32 %v1400_v33, %v443_v31  ;;  %v446_v35 = vmul.f32 %v1400_v33, %v441_v32 }
 0x11a   : > { %1032 = vmatpush3.bf16.msra.mxu0 %v464_v30 }
 0x11b   : > { %1033 = vmatprep.subr.bf16.mxu0 %v1343_v58  ;;  %v449_v38 = vpack.c.bf16 %v447_v34, %v446_v35 }
 0x11c   : > { %v439_v36 = vpop.permute.xlu1 %438  ;;  %v437_v37 = vpop.permute.xlu0 %436 }
 0x11d   : > { %v445_v39 = vmul.f32 %v1400_v33, %v439_v36  ;;  %v444_v40 = vmul.f32 %v1400_v33, %v437_v37 }
 0x11e   : > { %1034 = vmatpush3.bf16.msra.mxu0 %v1343_v58 }
 0x11f   : > { %1035 = vmatprep.subr.bf16.mxu0 %v1347_v1  ;;  %v448_v41 = vpack.c.bf16 %v445_v39, %v444_v40 }
 0x122   : > { %1036 = vmatpush3.bf16.msra.mxu0 %v1347_v1 }
 0x123   : > { %1037 = vmatprep.subr.bf16.mxu0 %v449_v38 }
 0x126   : > { %1038 = vmatpush3.bf16.msra.mxu0 %v449_v38 }
 0x127   : > { %1039 = vmatprep.subr.bf16.mxu0 %v448_v41 }
 0x129   : > { %v477_v43 = vpop.permute.xlu0 %476  ;;  %v482_v44 = vpop.permute.xlu1 %481 }
 0x12a   : > { %1040 = vmatpush3.bf16.msra.mxu0 %v448_v41 }
 0x12d   : > { %1042 = vmatmul.mubr.msk.bf16.vlgmr.msra.gmra.mxu0 %vm504_vm0, %v1107_v42  ;;  %v487_v45 = vpop.permute.xlu0 %486  ;;  %v492_v51 = vpop.permute.xlu1 %491 }
 0x1ed   : > { %v1043_v46 = vpop.f32.mrf.mxu0 }
 0x1ee   : > { %v554_v47 = vadd.f32 %v1043_v46, %v487_v45 }
 0x1ef   : > { %v545_v48 = vpop.f32.mrf.mxu0 }
 0x1f0   : > { %v983_v49 = vmul.f32 -1.442695, %v554_v47  ;;  %v546_v50 = vadd.f32 %v545_v48, %v477_v43 }
 0x1f1   : > { %v1044_v52 = vpop.f32.mrf.mxu0 }
 0x1f2   : > { %1112 = vpow2.f32 %v983_v49  ;;  %v981_v53 = vmul.f32 -1.442695, %v546_v50  ;;  %v557_v54 = vadd.f32 %v1044_v52, %v492_v51  ;;  %v644_v51 = vpop.permute.xlu0 %643 }
 0x1f3   : > { %v548_v55 = vpop.f32.mrf.mxu0 }
 0x1f4   : > { %1114 = vpow2.f32 %v981_v53  ;;  %v984_v56 = vmul.f32 -1.442695, %v557_v54  ;;  %v549_v57 = vadd.f32 %v548_v55, %v482_v44 }
 0x1f6   : > { %1116 = vpow2.f32 %v984_v56  ;;  %v982_v58 = vmul.f32 -1.442695, %v549_v57  ;;  %v673_v53 = vpop.permute.xlu0 %672 }
 0x1f8   : > { %1118 = vpow2.f32 %v982_v58 }
 0x1fa   : > { %v634_v55 = vpop.permute.xlu0 %633 }
 0x1ff   : > { %v1113_v59 = vpop.eup %1112 }
 0x200   : > { %v574_v61 = vadd.f32 1.0, %v1113_v59 }
 0x201   : > { %v1115_v60 = vpop.eup %1114 }
 0x202   : > { %v572_v62 = vadd.f32 1.0, %v1115_v60 }
 0x203   : > { %v1117_v63 = vpop.eup %1116 }
 0x204   : > { %1120 = vrcp.f32 %v572_v62  ;;  %v575_v0 = vadd.f32 1.0, %v1117_v63 }
 0x205   : > { %v1119_v1 = vpop.eup %1118  ;;  %1122 = vrcp.f32 %v574_v61 }
 0x206   : > { %v573_v2 = vadd.f32 1.0, %v1119_v1  ;;  %1124 = vrcp.f32 %v575_v0 }
 0x208   : > { %1126 = vrcp.f32 %v573_v2  ;;  %v663_v2 = vpop.permute.xlu0 %662 }
 0x211   : > { %v1121_v4 = vpop.eup %1120 }
 0x212   : > { %v1123_v6 = vpop.eup %1122  ;;  %v584_v9 = vmul.f32 %v1121_v4, %v546_v50  ;;  %v649_v50 = vpop.permute.xlu1 %648 }
 0x213   : > { %v1125_v8 = vpop.eup %1124  ;;  %v586_v12 = vmul.f32 %v1123_v6, %v554_v47 }
 0x214   : > { %v588_v14 = vmul.f32 %v584_v9, %v1427_v11  ;;  %v587_v15 = vmul.f32 %v1125_v8, %v557_v54 }
 0x215   : > { %v1127_v10 = vpop.eup %1126  ;;  %v590_v17 = vmul.f32 %v586_v12, %v1427_v11 }
 0x216   : > { %v585_v13 = vmul.f32 %v1127_v10, %v549_v57  ;;  %v591_v20 = vmul.f32 %v587_v15, %v1427_v11  ;;  %v678_v52 = vpop.permute.xlu1 %677  ;;  %v997_v15 = vld [vmem:[%s1527_s5 + $0x20] sm:$0xff] }
 0x218   : > { %v589_v16 = vmul.f32 %v585_v13, %v1427_v11  ;;  %v1108_v13 = vld [vmem:[%s1526_s4 + $0x10] sm:$0xff]  }
 0x219   : > { %1057 = vmatprep.mubr.msk.bf16.mxu1 %vm504_vm0, %v1108_v13 }
 0x21a   : > { %v592_v18 = vadd.f32 %v589_v16, %v588_v14  ;;  %v639_v54 = vpop.permute.xlu1 %638 }
 0x21c   : > { %v593_v21 = vadd.f32 %v592_v18, %v590_v17  ;;  %v842_v18 = vld [vmem:[%s1528_s6 + $0x8] sm:$0xff] }
 0x21e   : > { %v594_v22 = vadd.f32 %v593_v21, %v591_v20  ;;  %v668_v1 = vpop.permute.xlu1 %667  ;;  %v844_v21 = vld [vmem:[%s1528_s6 + $0x18] sm:$0xff] }
 0x220   : > { %v595_v23 = vrot.slane %v594_v22, 4 }
 0x222   : > { %v596_v24 = vadd.f32 %v595_v23, %v594_v22  ;;  %v843_v22 = vld [vmem:[%s1528_s6 + $0x10] sm:$0xff]  ;;  %v878_v23 = vld [vmem:[#allocation2] sm:$0x1] }
 0x224   : > { %v597_v25 = vrot.slane %v596_v24, 2 }
 0x226   : > { %v598_v26 = vadd.f32 %v597_v25, %v596_v24 }
 0x228   : > { %v599_v27 = vrot.slane %v598_v26, 1 }
 0x22a   : > { %v600_v28 = vadd.f32 %v599_v27, %v598_v26 }
 0x22c   : > { %v601_v29 = vmul.f32 0.03125, %v600_v28 }
 0x22e   : > { %v602_v30 = vsub.f32 %v588_v14, %v601_v29  ;;  %v603_v31 = vsub.f32 %v589_v16, %v601_v29  ;;  %v604_v32 = vsub.f32 %v590_v17, %v601_v29  ;;  %v605_v36 = vsub.f32 %v591_v20, %v601_v29  ;;  %v998_v14 = vld [vmem:[%s1527_s5 + $0x28] sm:$0xff]  ;;  %v1000_v16 = vld [vmem:[%s1527_s5 + $0x38] sm:$0xff]  ;;  %v999_v17 = vld [vmem:[%s1527_s5 + $0x30] sm:$0xff] }
 0x22f   : > { %v841_v20 = vld [vmem:[%s1528_s6] sm:$0xff] }
 0x230   : > { %v606_v34 = vmul.f32 %v602_v30, %v602_v30  ;;  %v607_v35 = vmul.f32 %v603_v31, %v603_v31  ;;  %v608_v37 = vmul.f32 %v604_v32, %v604_v32  ;;  %v609_v40 = vmul.f32 %v605_v36, %v605_v36 }
 0x232   : > { %v610_v38 = vadd.f32 %v607_v35, %v606_v34 }
 0x234   : > { %v611_v39 = vadd.f32 %v610_v38, %v608_v37 }
 0x236   : > { %v612_v41 = vadd.f32 %v611_v39, %v609_v40 }
 0x238   : > { %v613_v42 = vrot.slane %v612_v41, 4 }
 0x23a   : > { %v614_v43 = vadd.f32 %v613_v42, %v612_v41 }
 0x23c   : > { %v615_v44 = vrot.slane %v614_v43, 2 }
 0x23e   : > { %v616_v45 = vadd.f32 %v615_v44, %v614_v43  ;;  %v1109_v44 = vld [vmem:[%s1526_s4 + $0x18] sm:$0xff]  }
 0x240   : > { %v617_v46 = vrot.slane %v616_v45, 1 }
 0x242   : > { %v618_v47 = vadd.f32 %v617_v46, %v616_v45 }
 0x244   : > { %v619_v48 = vmul.f32 0.03125, %v618_v47 }
 0x246   : > { %v620_v49 = vadd.f32 0.0001, %v619_v48 }
 0x248   : > { %1128 = vrsqrt.f32 %v620_v49 }
 0x255   : > { %v1129_v56 = vpop.eup %1128 }
 0x256   : > { %v625_v57 = vmul.f32 %v1129_v56, %v605_v36  ;;  %v624_v58 = vmul.f32 %v1129_v56, %v604_v32  ;;  %v623_v59 = vmul.f32 %v1129_v56, %v603_v31  ;;  %v622_v60 = vmul.f32 %v1129_v56, %v602_v30 }
 0x258   : > { %v654_v61 = vmul.f32 %v649_v50, %v625_v57  ;;  %v653_v62 = vmul.f32 %v644_v51, %v624_v58  ;;  %v652_v63 = vmul.f32 %v639_v54, %v623_v59  ;;  %v651_v0 = vmul.f32 %v634_v55, %v622_v60 }
 0x25a   : > { %v683_v4 = vadd.f32 %v678_v52, %v654_v61  ;;  %v682_v6 = vadd.f32 %v673_v53, %v653_v62  ;;  %v681_v8 = vadd.f32 %v668_v1, %v652_v63  ;;  %v680_v9 = vadd.f32 %v663_v2, %v651_v0 }
 0x25c   : > { %706 = vrot.lane.b32.xlu1 %v683_v4, %s1209_s25  ;;  %704 = vrot.lane.b32.xlu0 %v682_v6, %s1209_s25  ;;  %v699_v10 = vpack.c.bf16 %v683_v4, %v682_v6  ;;  %v698_v12 = vpack.c.bf16 %v681_v8, %v680_v9 }
 0x260   : > { %702 = vrot.lane.b32.xlu1 %v681_v8, %s1209_s25  ;;  %700 = vrot.lane.b32.xlu0 %v680_v9, %s1209_s25  ;;  %s309_s25 = sand.u32 1, %s1198_s30  }
 0x261   : > { %s893_s22 = scalar_lea.sflag [#allocation4], %s309_s25 }
 0x264   : > { %690 = vrot.lane.b32.xlu1 %v683_v4, %s1210_s27  ;;  %688 = vrot.lane.b32.xlu0 %v682_v6, %s1210_s27 }
 0x268   : > { %686 = vrot.lane.b32.xlu1 %v681_v8, %s1210_s27  ;;  %684 = vrot.lane.b32.xlu0 %v680_v9, %s1210_s27  ;;  %s310_s27 = scalar_lea.vmem [#allocation3], %s309_s25 }
 0x269   : > { %s905_s18 = sshll.u32 %s310_s27, 4  ;;  %s906_s18 = int_to_ptr.vmem [resolvable:$true] %s905_s18 }
 0x26a   : > { %s1146_s26 = scalar_lea.vmem %s906_s18, 16  ;;  %p1153_p0 = scmp.lt.s32.totalorder %s906_s18, %s1151_s24 }
 0x26b   : > { %p1147_p11 = scmp.ne.s32.totalorder %s906_s18, %s1146_s26  ;;  %p1154_p1 = scmp.lt.s32.totalorder %s1152_s7, %s1146_s26 }
 0x26c   : > { %731 = vperm.xlu1 %1105, %v998_v14   ;;  %726 = vperm.xlu0 %1104, %v997_v15  }
 0x26d   : > { %p1148_p12 = pnand %p1147_p11, %p1299_p5  ;;  %p1155_p2 = por %p1154_p1, %p1153_p0 }
 0x26f   : > { %p1149_p13 = pneg %p1148_p12 }
 0x270   : > { %741 = vperm.xlu1 %1105, %v1000_v16   ;;  %736 = vperm.xlu0 %1104, %v999_v17  }
 0x271   : > { %p1156_p3 = pnand %p1155_p2, %p1149_p13 }
 0x274   : > { %852 = vperm.xlu1 %1105, %v842_v18   ;;  %847 = vperm.xlu0 %1104, %v841_v20  }
 0x278   : > { %862 = vperm.xlu1 %1105, %v844_v21   ;;  %857 = vperm.xlu0 %1104, %v843_v22  }
 0x27c   : > { %881 = vperm.xlu0 %1104, %v878_v23  }
 0x2ce   : > { %v707_v24 = vpop.permute.xlu1 %706  ;;  %v705_v25 = vpop.permute.xlu0 %704 }
 0x2cf   : > { %v711_v26 = vmul.f32 %v1394_v19, %v707_v24  ;;  %v710_v27 = vmul.f32 %v1394_v19, %v705_v25 }
 0x2d1   : > { %v713_v28 = vpack.c.bf16 %v711_v26, %v710_v27 }
 0x2d2   : > { %v703_v29 = vpop.permute.xlu1 %702  ;;  %v701_v30 = vpop.permute.xlu0 %700 }
 0x2d3   : > { %v709_v31 = vmul.f32 %v1394_v19, %v703_v29  ;;  %v708_v32 = vmul.f32 %v1394_v19, %v701_v30  ;;  %1045 = vmatprep.subr.bf16.mxu1 %v713_v28 }
 0x2d4   : > { %1046 = vmatpush3.bf16.msra.mxu1 %v713_v28 }
 0x2d5   : > { %v712_v34 = vpack.c.bf16 %v709_v31, %v708_v32 }
 0x2d6   : > { %v691_v35 = vpop.permute.xlu1 %690  ;;  %v689_v36 = vpop.permute.xlu0 %688 }
 0x2d7   : > { %1047 = vmatprep.subr.bf16.mxu1 %v712_v34  ;;  %v695_v37 = vmul.f32 %v1400_v33, %v691_v35  ;;  %v694_v38 = vmul.f32 %v1400_v33, %v689_v36 }
 0x2d8   : > { %1048 = vmatpush3.bf16.msra.mxu1 %v712_v34 }
 0x2d9   : > { %1049 = vmatprep.subr.bf16.mxu1 %v699_v10  ;;  %v697_v41 = vpack.c.bf16 %v695_v37, %v694_v38 }
 0x2da   : > { %v687_v39 = vpop.permute.xlu1 %686  ;;  %v685_v40 = vpop.permute.xlu0 %684 }
 0x2db   : > { %v693_v42 = vmul.f32 %v1400_v33, %v687_v39  ;;  %v692_v19 = vmul.f32 %v1400_v33, %v685_v40 }
 0x2dc   : > { %1050 = vmatpush3.bf16.msra.mxu1 %v699_v10 }
 0x2dd   : > { %1051 = vmatprep.subr.bf16.mxu1 %v698_v12  ;;  %v696_v43 = vpack.c.bf16 %v693_v42, %v692_v19 }
 0x2e0   : > { %1052 = vmatpush3.bf16.msra.mxu1 %v698_v12 }
 0x2e1   : > { %1053 = vmatprep.subr.bf16.mxu1 %v697_v41 }
 0x2e4   : > { %1054 = vmatpush3.bf16.msra.mxu1 %v697_v41 }
 0x2e5   : > { %1055 = vmatprep.subr.bf16.mxu1 %v696_v43 }
 0x2e7   : > { %v727_v45 = vpop.permute.xlu0 %726  ;;  %v732_v46 = vpop.permute.xlu1 %731 }
 0x2e8   : > { %1056 = vmatpush3.bf16.msra.mxu1 %v696_v43 }
 0x2eb   : > { %1058 = vmatmul.mubr.msk.bf16.vlgmr.msra.gmra.mxu1 %vm504_vm0, %v1109_v44  ;;  %v737_v47 = vpop.permute.xlu0 %736  ;;  %v742_v52 = vpop.permute.xlu1 %741 }
 0x2ef   : > { %v848_v14 = vpop.permute.xlu0 %847  ;;  %v853_v18 = vpop.permute.xlu1 %852 }
 0x2f3   : > { %v858_v25 = vpop.permute.xlu0 %857  ;;  %v863_v28 = vpop.permute.xlu1 %862 }
 0x2f7   : > { %v882_v37 = vpop.permute.xlu0 %881 }
 0x3ab   : > { %v1059_v48 = vpop.f32.mrf.mxu1 }
 0x3ac   : > { %v803_v49 = vadd.f32 %v1059_v48, %v737_v47 }
 0x3ad   : > { %v794_v50 = vpop.f32.mrf.mxu1 }
 0x3ae   : > { %v1007_v51 = vmul.f32 -1.442695, %v803_v49  ;;  %v795_v33 = vadd.f32 %v794_v50, %v727_v45 }
 0x3af   : > { %v1060_v53 = vpop.f32.mrf.mxu1 }
 0x3b0   : > { %1130 = vpow2.f32 %v1007_v51  ;;  %v1005_v54 = vmul.f32 -1.442695, %v795_v33  ;;  %v806_v55 = vadd.f32 %v1060_v53, %v742_v52 }
 0x3b1   : > { %v797_v56 = vpop.f32.mrf.mxu1 }
 0x3b2   : > { %1132 = vpow2.f32 %v1005_v54  ;;  %v1008_v57 = vmul.f32 -1.442695, %v806_v55  ;;  %v798_v58 = vadd.f32 %v797_v56, %v732_v46 }
 0x3b4   : > { %1134 = vpow2.f32 %v1008_v57  ;;  %v1006_v59 = vmul.f32 -1.442695, %v798_v58 }
 0x3b6   : > { %1136 = vpow2.f32 %v1006_v59 }
 0x3bd   : > { %v1131_v60 = vpop.eup %1130 }
 0x3be   : > { %v823_v61 = vadd.f32 1.0, %v1131_v60 }
 0x3bf   : > { %v1133_v62 = vpop.eup %1132 }
 0x3c0   : > { %v821_v63 = vadd.f32 1.0, %v1133_v62  ;;  %1138 = vrcp.f32 %v823_v61 }
 0x3c1   : > { %v1135_v0 = vpop.eup %1134 }
 0x3c2   : > { %1140 = vrcp.f32 %v821_v63  ;;  %v824_v1 = vadd.f32 1.0, %v1135_v0 }
 0x3c3   : > { %v1137_v2 = vpop.eup %1136 }
 0x3c4   : > { %1142 = vrcp.f32 %v824_v1  ;;  %v822_v4 = vadd.f32 1.0, %v1137_v2 }
 0x3c6   : > { %1144 = vrcp.f32 %v822_v4 }
 0x3cd   : > { %v1139_v6 = vpop.eup %1138 }
 0x3ce   : > { %v835_v12 = vmul.f32 %v1139_v6, %v803_v49 }
 0x3cf   : > { %v1141_v8 = vpop.eup %1140 }
 0x3d0   : > { %v833_v9 = vmul.f32 %v1141_v8, %v795_v33  ;;  %v839_v20 = vmul.f32 %v835_v12, %v1427_v11 }
 0x3d1   : > { %v1143_v10 = vpop.eup %1142 }
 0x3d2   : > { %v837_v15 = vmul.f32 %v833_v9, %v1427_v11  ;;  %v836_v16 = vmul.f32 %v1143_v10, %v806_v55  ;;  %v867_v26 = vmul.f32 %v858_v25, %v839_v20 }
 0x3d3   : > { %v1145_v13 = vpop.eup %1144 }
 0x3d4   : > { %v834_v17 = vmul.f32 %v1145_v13, %v798_v58  ;;  %v865_v22 = vmul.f32 %v848_v14, %v837_v15  ;;  %v840_v23 = vmul.f32 %v836_v16, %v1427_v11 }
 0x3d6   : > { %v838_v21 = vmul.f32 %v834_v17, %v1427_v11  ;;  %v868_v29 = vmul.f32 %v863_v28, %v840_v23  ;;  %v887_v11 = vrot.slane %v882_v37, %v324_v5 }
 0x3d8   : > { %v866_v24 = vmul.f32 %v853_v18, %v838_v21 }
 0x3da   : > { %v869_v27 = vadd.f32 %v866_v24, %v865_v22 }
 0x3dc   : > { %v870_v30 = vadd.f32 %v869_v27, %v867_v26 }
 0x3de   : > { %v871_v31 = vadd.f32 %v870_v30, %v868_v29 }
 0x3e0   : > { %v872_v32 = vrot.slane %v871_v31, 4 }
 0x3e2   : > { %v873_v34 = vadd.f32 %v872_v32, %v871_v31 }
 0x3e4   : > { %v874_v35 = vrot.slane %v873_v34, 2 }
 0x3e6   : > { %v875_v36 = vadd.f32 %v874_v35, %v873_v34 }
 0x3e8   : > { %v876_v38 = vrot.slane %v875_v36, 1 }
 0x3ea   : > { %v877_v39 = vadd.f32 %v876_v38, %v875_v36 }
 0x3ec   : > { %v888_v40 = vadd.f32 %v887_v11, %v877_v39 }
 0x3ee   : > { %v889_v41 = vmul.f32 %v888_v40, %v1422_v7 }
 0x3f0   : > { %v890_v42 = vmax.f32 %v889_v41, 0.0 }
 0x3f2   : > { %891 = vst [vmem:[%s310_s27] sm:$0x1] %v890_v42 }
 0x3f3   : > { %1159 = shalt.err (!%p1156_p3)
}
 0x3f4   : > { %s1160_s28 = scalar_lea.hbm %s903_s21, 16  ;;  %s1164_s25 = scalar_lea.hbm %s1530_s8, 32 }
 0x3f5   : > { %p1161_p4 = scmp.ne.s32.totalorder %s903_s21, %s1160_s28  ;;  %p1165_p9 = scmp.lt.s32.totalorder %s903_s21, %s1530_s8 }
 0x3f6   : > { %p1166_p10 = scmp.lt.s32.totalorder %s1164_s25, %s1160_s28 }
 0x3f7   : > { %p1162_p7 = pnand %p1161_p4, %p1299_p5 }
 0x3f8   : > { %p1167_p11 = por %p1166_p10, %p1165_p9 }
 0x3f9   : > { %p1163_p8 = pneg %p1162_p7 }
 0x3fb   : > { %p1168_p12 = pnand %p1167_p11, %p1163_p8 }
 0x3fd   : > { %1171 = shalt.err (!%p1168_p12)
}
 0x3fe   : > { %1061 = dma.vmem_to_hbm [thread:$0]  (%p1299_p5), %s906_s18, 16, %s903_s21, %s893_s22  }
 0x3ff PF: > { %p1067_p13 = scmp.ge.s32.totalorder %s1206_s10, 2  ;;  %s917_s19 = sand.u32 1, %s1194_s29  }
 0x400   : > { %s918_s20 = scalar_lea.sflag [#allocation4], %s917_s19 }
 0x401   : > { %p1064_p0 = pnand %p1067_p13, %p1303_p6 }
 0x403   : > { %p1065_p1 = pneg %p1064_p0 }
 0x405   : > { %1189 = dma.done.wait (%p1065_p1), %s918_s20, 16  }
 0x406   : > { %1191 = vsyncadd (%p1065_p1), %s918_s20, 4294967280  ;;  %p20_p2 = scmp.ge.s32.totalorder %s1286_s12, 4   ;;  %s1533_s29 = smov %s1198_s30 }
 0x407   : > { %s1534_s30 = smov %s1202_s9  ;;  %s1535_s9 = smov %s1297_s15 }
 0x408   : > { %s1536_s10 = smov %s1286_s12  ;;  %22 = sbr.rel (!%p20_p2) target bundleno = 6 (0x6), region = 94 }
 0x40d   :  { %922 = vsyncpa [#allocation4], 1 }
 0x40e   :  { %924 = vsyncpa [#allocation4 + $0x1], 1 }

</bundles_post_ra>
